<compile_context>
chip_gen: v7x
topology: tpu7x:2x2x1
jax: 0.10.0
libtpu: 0.0.40
codegen_flags: <defaults>
</compile_context>

<pallas_src>
import functools

import jax
import jax.numpy as jnp
from jax import lax
from jax.experimental import pallas as pl
from jax.experimental.pallas import tpu as pltpu


def _round_up(x, m):
    return ((x + m - 1) // m) * m


# ---------------------------------------------------------------------------
# Fast path: tables staged in VMEM, on-chip one-hot gather on the (otherwise idle) MXU.
# ---------------------------------------------------------------------------
def mf_vmem_kernel(uid_ref, mid_ref, users_ref, movies_ref, out_ref):
    """One grid step == one batch tile of TB (user, movie) pairs.

    uid_ref/mid_ref  : VMEM int32 (TB, 1) blocks of the padded id vectors
    users_ref/movies_ref : VMEM f32 (Upad, Dp) / (Mpad, Dp) bias-augmented tables
                           (constant block index -> copied to VMEM once, then resident)
    out_ref : VMEM f32 (8, TB) lane-dense output block
    """
    TB = uid_ref.shape[0]
    Upad, Dp = users_ref.shape
    Mpad = movies_ref.shape[0]

    uid = uid_ref[...]                                             # (TB, 1)
    mid = mid_ref[...]

    # On-chip gather: one-hot (TB, U) built from a lane iota, then one-hot @ table.
    u_oh = (lax.broadcasted_iota(jnp.int32, (TB, Upad), 1) == uid).astype(jnp.float32)
    m_oh = (lax.broadcasted_iota(jnp.int32, (TB, Mpad), 1) == mid).astype(jnp.float32)
    u_rows = jnp.dot(u_oh, users_ref[...], preferred_element_type=jnp.float32)   # (TB, Dp)
    m_rows = jnp.dot(m_oh, movies_ref[...], preferred_element_type=jnp.float32)  # (TB, Dp)

    # Row-wise dot (bias terms ride along in the augmented columns), reduced over Dp on
    # the MXU so the lane-dense (8, TB) block is produced directly (no XLU transpose,
    # no cross-sublane reduce, no broadcast).
    prod = u_rows * m_rows                                         # (TB, Dp)
    ones = jnp.ones((8, Dp), jnp.float32)
    out_ref[...] = lax.dot_general(ones, prod, (((1,), (1,)), ((), ())),
                                   preferred_element_type=jnp.float32)


# ---------------------------------------------------------------------------
# Fallback path: tables stay in HBM, per-row gather DMAs, double-buffered across tiles.
# ---------------------------------------------------------------------------
def mf_hbm_kernel(uid_ref, mid_ref, users_hbm, movies_hbm, out_ref, ubuf, mbuf, sem):
    """uid_ref/mid_ref : SMEM int32 [Bp]            (scalar prefetch)
    users_hbm/movies_hbm : HBM f32 [Upad, Dp] / [Mpad, Dp]
    out_ref : VMEM f32 (8, TB) block
    ubuf/mbuf : VMEM f32 (2, TB, Dp) double-buffered gather buffers
    sem : DMA semaphores (2, 2)   indexed [slot, table]
    """
    t = pl.program_id(0)
    nt = pl.num_programs(0)
    _, TB, Dp = ubuf.shape
    UNROLL = 8  # TB is always a multiple of 128, so 8 divides it

    def issue(tile, slot):
        base = tile * TB

        @pl.loop(0, TB, step=UNROLL)
        def _issue(i0):
            for u in range(UNROLL):          # partial unroll: pack DMA starts densely
                i = i0 + u
                uid = uid_ref[base + i]
                mid = mid_ref[base + i]
                pltpu.make_async_copy(
                    users_hbm.at[pl.ds(uid, 1)], ubuf.at[slot, pl.ds(i, 1)],
                    sem.at[slot, 0]).start()
                pltpu.make_async_copy(
                    movies_hbm.at[pl.ds(mid, 1)], mbuf.at[slot, pl.ds(i, 1)],
                    sem.at[slot, 1]).start()

    slot = t % 2

    # Prime the pipeline on the first tile (grid is sequential: "arbitrary" semantics).
    @pl.when(t == 0)
    def _():
        issue(0, 0)

    # Prefetch the next tile into the other slot before draining this one, so the
    # gather latency of tile t+1 hides behind tile t's compute.
    @pl.when(t + 1 < nt)
    def _():
        issue(t + 1, 1 - slot)

    # Single full-buffer wait per table: DMA semaphores are byte-counted, so one wait
    # sized to the whole (TB, Dp) buffer retires all TB row gathers of this slot.
    pltpu.make_async_copy(ubuf.at[slot], ubuf.at[slot], sem.at[slot, 0]).wait()
    pltpu.make_async_copy(mbuf.at[slot], mbuf.at[slot], sem.at[slot, 1]).wait()

    prod = ubuf[slot] * mbuf[slot]                                 # (TB, Dp)
    ones = jnp.ones((8, Dp), jnp.float32)
    out_ref[...] = lax.dot_general(ones, prod, (((1,), (1,)), ((), ())),
                                   preferred_element_type=jnp.float32)
    # TODO(synk): v5e-specific HBM-row narrowing (store rows at round_up(D+2,32) floats
    # instead of 128) not implemented; only matters once descriptor overhead is gone.


def augment_tables(users, movies, user_bias, movie_bias):
    """Fold the bias embeddings into two extra feature columns (once, off the hot path):
         users_aug[i]  = [users[i],  user_bias[i], 1, 0-pad]
         movies_aug[j] = [movies[j], 1, movie_bias[j], 0-pad]
    so the forward is a single row-wise dot of the two augmented rows.
    Rows are padded to a multiple of 128 and columns to a multiple of 128 (lane-aligned).
    """
    U, D = users.shape
    M, _ = movies.shape
    Dp = _round_up(D + 2, 128)
    Upad = _round_up(U, 128)
    Mpad = _round_up(M, 128)
    ua = jnp.zeros((Upad, Dp), jnp.float32)
    ua = ua.at[:U, :D].set(users.astype(jnp.float32))
    ua = ua.at[:U, D].set(user_bias.reshape(U).astype(jnp.float32))
    ua = ua.at[:U, D + 1].set(1.0)
    ma = jnp.zeros((Mpad, Dp), jnp.float32)
    ma = ma.at[:M, :D].set(movies.astype(jnp.float32))
    ma = ma.at[:M, D].set(1.0)
    ma = ma.at[:M, D + 1].set(movie_bias.reshape(M).astype(jnp.float32))
    return ua, ma


@functools.partial(jax.jit,
                   static_argnames=("num_users", "num_movies", "block_b", "force_hbm_gather"))
def matrix_factorizer_forward(user_ids, movie_ids, users_aug, movies_aug, *,
                              num_users, num_movies, block_b=512, force_hbm_gather=False):
    """Pallas forward. user_ids/movie_ids: [B] int. Returns [B] float32 scores."""
    B = user_ids.shape[0]
    Upad, Dp = users_aug.shape
    Mpad, _ = movies_aug.shape

    # torch padding_idx=-1 style normalization + clamp so ids can never go OOB.
    uid = user_ids.astype(jnp.int32)
    mid = movie_ids.astype(jnp.int32)
    uid = jnp.clip(jnp.where(uid < 0, uid + num_users, uid), 0, num_users - 1)
    mid = jnp.clip(jnp.where(mid < 0, mid + num_movies, mid), 0, num_movies - 1)

    # Batch tile: lane-dense multiple of 128; keep >= 2 tiles when the batch is large
    # enough so a "parallel" grid axis can still split across v7x's two TensorCores.
    TB = _round_up(min(block_b, max(B, 1)), 128)
    if B > 256:
        TB = min(TB, _round_up(pl.cdiv(B, 2), 128))
    num_tiles = pl.cdiv(B, TB)
    Bp = num_tiles * TB

    uid_p = jnp.zeros((Bp,), jnp.int32).at[:B].set(uid)
    mid_p = jnp.zeros((Bp,), jnp.int32).at[:B].set(mid)

    # Small-table fast path gate: staged tables (x2 for Pallas' default double buffer)
    # plus the (TB, Upad/Mpad) one-hot intermediates must fit comfortably inside v7x's
    # 64 MiB VMEM per core; above that, fall back to the HBM row-gather path.
    table_bytes = (Upad + Mpad) * Dp * 4
    use_vmem_path = (not force_hbm_gather
                     and Upad <= 2048 and Mpad <= 2048
                     and table_bytes <= 8 * 1024 * 1024)

    compiler_params = pltpu.CompilerParams(
        dimension_semantics=("parallel",) if use_vmem_path else ("arbitrary",),
        vmem_limit_bytes=48 * 1024 * 1024,   # above the 16/32 MiB scoped defaults, < v7x 64 MiB
    )

    if use_vmem_path:
        grid_spec = pltpu.PrefetchScalarGridSpec(
            num_scalar_prefetch=0,
            grid=(num_tiles,),
            in_specs=[
                pl.BlockSpec((TB, 1), lambda t: (t, 0)),        # user ids
                pl.BlockSpec((TB, 1), lambda t: (t, 0)),        # movie ids
                pl.BlockSpec((Upad, Dp), lambda t: (0, 0)),     # users table: copied once, resident
                pl.BlockSpec((Mpad, Dp), lambda t: (0, 0)),     # movies table: copied once, resident
            ],
            out_specs=pl.BlockSpec((8, TB), lambda t: (0, t)),
        )
        out = pl.pallas_call(
            mf_vmem_kernel,
            out_shape=jax.ShapeDtypeStruct((8, Bp), jnp.float32),
            grid_spec=grid_spec,
            compiler_params=compiler_params,
        )(uid_p.reshape(Bp, 1), mid_p.reshape(Bp, 1), users_aug, movies_aug)
    else:
        grid_spec = pltpu.PrefetchScalarGridSpec(
            num_scalar_prefetch=2,                              # ids land in SMEM before the grid
            grid=(num_tiles,),
            in_specs=[pl.BlockSpec(memory_space=pl.ANY),        # users table stays in HBM
                      pl.BlockSpec(memory_space=pl.ANY)],       # movies table stays in HBM
            out_specs=pl.BlockSpec((8, TB), lambda t, uids, mids: (0, t)),
            scratch_shapes=[pltpu.VMEM((2, TB, Dp), jnp.float32),
                            pltpu.VMEM((2, TB, Dp), jnp.float32),
                            pltpu.SemaphoreType.DMA((2, 2))],
        )
        out = pl.pallas_call(
            mf_hbm_kernel,
            out_shape=jax.ShapeDtypeStruct((8, Bp), jnp.float32),
            grid_spec=grid_spec,
            compiler_params=compiler_params,
        )(uid_p, mid_p, users_aug, movies_aug)

    return out[0, :B]   # lane-dense row 0 holds the results; mimics torch .squeeze()


def init_params(key, num_users, num_movies, model_dim):
    """Deterministic init matching nn.Embedding: N(0,1), padding row (last row) zeroed."""
    k1, k2, k3, k4 = jax.random.split(key, 4)
    users = jax.random.normal(k1, (num_users, model_dim), jnp.float32)
    movies = jax.random.normal(k2, (num_movies, model_dim), jnp.float32)
    user_bias = jax.random.normal(k3, (num_users, 1), jnp.float32)
    movie_bias = jax.random.normal(k4, (num_movies, 1), jnp.float32)
    # padding_idx=-1 -> row (num_embeddings - 1) is zero-initialized
    users = users.at[-1].set(0.0)
    movies = movies.at[-1].set(0.0)
    user_bias = user_bias.at[-1].set(0.0)
    movie_bias = movie_bias.at[-1].set(0.0)
    return users, movies, user_bias, movie_bias


if __name__ == "__main__":
    num_users, num_movies, model_dim = 64, 96, 32

    key = jax.random.PRNGKey(0)
    kp, ku, km, ku2, km2 = jax.random.split(key, 5)
    users, movies, user_bias, movie_bias = init_params(kp, num_users, num_movies, model_dim)
    users_aug, movies_aug = augment_tables(users, movies, user_bias, movie_bias)

    def reference(uids, mids):
        return (jnp.sum(users[uids] * movies[mids], axis=-1)
                + user_bias[uids, 0] + movie_bias[mids, 0])

    # Tolerances accommodate MXU f32 multi-pass rounding; structural errors are O(1).
    ATOL, RTOL = 5e-2, 1e-2

    # 1) Small-table fast path: tables staged in VMEM, on-chip one-hot MXU gather.
    batch = 16
    user_ids = jax.random.randint(ku, (batch,), 0, num_users, dtype=jnp.int32)
    movie_ids = jax.random.randint(km, (batch,), 0, num_movies, dtype=jnp.int32)
    out = matrix_factorizer_forward(user_ids, movie_ids, users_aug, movies_aug,
                                    num_users=num_users, num_movies=num_movies)
    out = jax.block_until_ready(out)
    ref = reference(user_ids, movie_ids)
    assert out.shape == (batch,)
    assert jnp.allclose(out, ref, atol=ATOL, rtol=RTOL), (out, ref)

    # 2) Large-table fallback path (HBM row gathers, cross-tile double buffering,
    #    single byte-counted wait per semaphore), forced on a multi-tile batch so the
    #    prefetch pipeline is actually exercised.
    batch2 = 300
    user_ids2 = jax.random.randint(ku2, (batch2,), 0, num_users, dtype=jnp.int32)
    movie_ids2 = jax.random.randint(km2, (batch2,), 0, num_movies, dtype=jnp.int32)
    out2 = matrix_factorizer_forward(user_ids2, movie_ids2, users_aug, movies_aug,
                                     num_users=num_users, num_movies=num_movies,
                                     block_b=128, force_hbm_gather=True)
    out2 = jax.block_until_ready(out2)
    ref2 = reference(user_ids2, movie_ids2)
    assert out2.shape == (batch2,)
    assert jnp.allclose(out2, ref2, atol=ATOL, rtol=RTOL), (out2, ref2)

    print("KERNEL_OK")
</pallas_src>

<mosaic_0001>
module attributes {stable_mosaic.version = 11 : i64} {
  func.func @mf_vmem_kernel(%arg0: i32, %arg1: memref<128x1xi32, #tpu.memory_space<vmem>>, %arg2: memref<128x1xi32, #tpu.memory_space<vmem>>, %arg3: memref<128x128xf32, #tpu.memory_space<vmem>>, %arg4: memref<128x128xf32, #tpu.memory_space<vmem>>, %arg5: memref<8x128xf32, #tpu.memory_space<vmem>>) attributes {dimension_semantics = [#tpu.dimension_semantics<parallel>], iteration_bounds = array<i64: 1>, scalar_prefetch = 0 : i64, scratch_operands = 0 : i64, tpu.core_type = #tpu.core_type<tc>, window_params = [{transform_indices = @transform_0, window_bounds = array<i64: 128, 1>}, {transform_indices = @transform_1, window_bounds = array<i64: 128, 1>}, {pipeline_mode = #tpu.pipeline_mode<synchronous>, transform_indices = @transform_2, window_bounds = array<i64: 128, 128>}, {pipeline_mode = #tpu.pipeline_mode<synchronous>, transform_indices = @transform_3, window_bounds = array<i64: 128, 128>}, {transform_indices = @transform_4, window_bounds = array<i64: 8, 128>}]} {
    %c0 = arith.constant 0 : index
    %c0_0 = arith.constant 0 : index
    %0 = vector.load %arg1[%c0, %c0_0] : memref<128x1xi32, #tpu.memory_space<vmem>>, vector<128x1xi32>
    %c0_1 = arith.constant 0 : index
    %c0_2 = arith.constant 0 : index
    %1 = vector.load %arg2[%c0_1, %c0_2] : memref<128x1xi32, #tpu.memory_space<vmem>>, vector<128x1xi32>
    %2 = tpu.iota {dimensions = array<i32: 1>} : vector<128x128xi32>
    %3 = vector.broadcast %0 : vector<128x1xi32> to vector<128x128xi32>
    %4 = arith.cmpi eq, %2, %3 : vector<128x128xi32>
    %5 = arith.extui %4 : vector<128x128xi1> to vector<128x128xi32>
    %6 = arith.sitofp %5 : vector<128x128xi32> to vector<128x128xf32>
    %7 = tpu.iota {dimensions = array<i32: 1>} : vector<128x128xi32>
    %8 = vector.broadcast %1 : vector<128x1xi32> to vector<128x128xi32>
    %9 = arith.cmpi eq, %7, %8 : vector<128x128xi32>
    %10 = arith.extui %9 : vector<128x128xi1> to vector<128x128xi32>
    %11 = arith.sitofp %10 : vector<128x128xi32> to vector<128x128xf32>
    %c0_3 = arith.constant 0 : index
    %c0_4 = arith.constant 0 : index
    %12 = vector.load %arg3[%c0_3, %c0_4] : memref<128x128xf32, #tpu.memory_space<vmem>>, vector<128x128xf32>
    %cst = arith.constant dense<0.000000e+00> : vector<128x128xf32>
    %13 = tpu.matmul %6, %12, %cst {dimension_numbers = #tpu.dot_dimension_numbers<[1], [0], [0], [1], [0, 0, 1, 1], [], []>} : vector<128x128xf32>, vector<128x128xf32>, vector<128x128xf32> -> vector<128x128xf32>
    %c0_5 = arith.constant 0 : index
    %c0_6 = arith.constant 0 : index
    %14 = vector.load %arg4[%c0_5, %c0_6] : memref<128x128xf32, #tpu.memory_space<vmem>>, vector<128x128xf32>
    %cst_7 = arith.constant dense<0.000000e+00> : vector<128x128xf32>
    %15 = tpu.matmul %11, %14, %cst_7 {dimension_numbers = #tpu.dot_dimension_numbers<[1], [0], [0], [1], [0, 0, 1, 1], [], []>} : vector<128x128xf32>, vector<128x128xf32>, vector<128x128xf32> -> vector<128x128xf32>
    %16 = arith.mulf %13, %15 : vector<128x128xf32>
    %cst_8 = arith.constant 1.000000e+00 : f32
    %17 = vector.broadcast %cst_8 : f32 to vector<8x128xf32>
    %cst_9 = arith.constant dense<0.000000e+00> : vector<8x128xf32>
    %18 = tpu.matmul %17, %16, %cst_9 {dimension_numbers = #tpu.dot_dimension_numbers<[1], [1], [0], [0], [0, 0, 1, 0], [], []>} : vector<8x128xf32>, vector<128x128xf32>, vector<8x128xf32> -> vector<8x128xf32>
    %c0_10 = arith.constant 0 : index
    %c0_11 = arith.constant 0 : index
    %19 = vector.load %arg5[%c0_10, %c0_11] : memref<8x128xf32, #tpu.memory_space<vmem>>, vector<8x128xf32>
    tpu.vector_store %arg5[%c0_10, %c0_11], %18 {strides = array<i32>} : memref<8x128xf32, #tpu.memory_space<vmem>>, vector<8x128xf32>,
    return
  }
  func.func @transform_0(%arg0: i32) -> (i32, i32) {
    %c0_i32 = arith.constant 0 : i32
    %c0_i32_0 = arith.constant 0 : i32
    return %arg0, %c0_i32 : i32, i32
  }
  func.func @transform_1(%arg0: i32) -> (i32, i32) {
    %c0_i32 = arith.constant 0 : i32
    %c0_i32_0 = arith.constant 0 : i32
    return %arg0, %c0_i32 : i32, i32
  }
  func.func @transform_2(%arg0: i32) -> (i32, i32) {
    %c0_i32 = arith.constant 0 : i32
    %c0_i32_0 = arith.constant 0 : i32
    %c0_i32_1 = arith.constant 0 : i32
    return %c0_i32, %c0_i32_0 : i32, i32
  }
  func.func @transform_3(%arg0: i32) -> (i32, i32) {
    %c0_i32 = arith.constant 0 : i32
    %c0_i32_0 = arith.constant 0 : i32
    %c0_i32_1 = arith.constant 0 : i32
    return %c0_i32, %c0_i32_0 : i32, i32
  }
  func.func @transform_4(%arg0: i32) -> (i32, i32) {
    %c0_i32 = arith.constant 0 : i32
    %c0_i32_0 = arith.constant 0 : i32
    return %c0_i32, %arg0 : i32, i32
  }
}

</mosaic_0001>

<bundles_post_ra>
// kernel: matrix_factorizer_forward.1
= control target key start
LH: loop header
LB: loop body
LE: loop exit
PB: predicated region body
PF: predicated region fallthrough
CT: control target
= control target key end

     0   :  { %v1043_v0 = vmov 0   ;;  %v49_v60 = vlaneseq  ;;  %s1343_s0 = inlined_call_operand.vmem [shape: s32[128,1], index: 0, kind: input, shape index: {}]   ;;  %s1344_s2 = inlined_call_operand.vmem [shape: f32[128,128], index: 2, kind: input, shape index: {}]   ;;  %s1345_s1 = inlined_call_operand.vmem [shape: s32[128,1], index: 1, kind: input, shape index: {}]   ;;  %s1346_s3 = inlined_call_operand.vmem [shape: f32[128,128], index: 3, kind: input, shape index: {}]   ;;  %s1347_s4 = inlined_call_operand.vmem [shape: f32[8,128], index: 4, kind: output, shape index: {}]  }
   0x1   :  { %1042 = vset.pattern.permute.xlu1 %v1043_v0  ;;  %1041 = vset.pattern.permute.xlu0 %v1043_v0  ;;  %v19_v1 = vld [vmem:[%s1343_s0 + $0x10] sm:$0xff]  ;;  %v17_v2 = vld [vmem:[%s1343_s0] sm:$0xff]  ;;  %v20_v3 = vld [vmem:[%s1343_s0 + $0x18] sm:$0xff] }
   0x2   :  { %58 = vperm.xlu1 %1042, %v19_v1   ;;  %52 = vperm.xlu0 %1041, %v17_v2   ;;  %v18_v4 = vld [vmem:[%s1343_s0 + $0x8] sm:$0xff]  ;;  %v21_v6 = vld [vmem:[%s1343_s0 + $0x20] sm:$0xff]  ;;  %v24_v7 = vld [vmem:[%s1343_s0 + $0x38] sm:$0xff]  ;;  %v1223_v61 = vand.u32 127, %v49_v60  ;;  %v1044_v2 = vmov 1.0  }
   0x3   :  { %v22_v5 = vld [vmem:[%s1343_s0 + $0x28] sm:$0xff]  ;;  %v23_v8 = vld [vmem:[%s1343_s0 + $0x30] sm:$0xff]  ;;  %v243_v9 = vld [vmem:[%s1344_s2] sm:$0xff] }
   0x4   :  { %v244_v10 = vld [vmem:[%s1344_s2 + $0x8] sm:$0xff]  ;;  %v245_v11 = vld [vmem:[%s1344_s2 + $0x10] sm:$0xff]  ;;  %v246_v12 = vld [vmem:[%s1344_s2 + $0x18] sm:$0xff] }
   0x5   :  { %v948_v13 = vpack.c.bf16 %v244_v10, %v243_v9  ;;  %v952_v14 = vpack.c.bf16 %v246_v12, %v245_v11  ;;  %v247_v15 = vld [vmem:[%s1344_s2 + $0x20] sm:$0xff]  ;;  %v248_v16 = vld [vmem:[%s1344_s2 + $0x28] sm:$0xff]  ;;  %v249_v20 = vld [vmem:[%s1344_s2 + $0x30] sm:$0xff] }
   0x6   :  { %61 = vperm.xlu1 %1042, %v20_v3   ;;  %55 = vperm.xlu0 %1041, %v18_v4   ;;  %v26_v17 = vld [vmem:[%s1343_s0 + $0x48] sm:$0xff]  ;;  %v25_v18 = vld [vmem:[%s1343_s0 + $0x40] sm:$0xff]  ;;  %v956_v19 = vpack.c.bf16 %v248_v16, %v247_v15  ;;  %v250_v21 = vld [vmem:[%s1344_s2 + $0x38] sm:$0xff] }
   0x7   :  { %949 = vmatprep.subr.bf16.mxu1 %v948_v13  ;;  %v28_v22 = vld [vmem:[%s1343_s0 + $0x58] sm:$0xff]  ;;  %v27_v23 = vld [vmem:[%s1343_s0 + $0x50] sm:$0xff]  ;;  %v960_v24 = vpack.c.bf16 %v250_v21, %v249_v20  ;;  %v251_v25 = vld [vmem:[%s1344_s2 + $0x40] sm:$0xff] }
   0x8   :  { %951 = vmatpush3.bf16.msra.mxu1 %v948_v13  ;;  %v252_v26 = vld [vmem:[%s1344_s2 + $0x48] sm:$0xff]  ;;  %v29_v28 = vld [vmem:[%s1343_s0 + $0x60] sm:$0xff]  ;;  %v253_v30 = vld [vmem:[%s1344_s2 + $0x50] sm:$0xff] }
   0x9   :  { %953 = vmatprep.subr.bf16.mxu1 %v952_v14  ;;  %v30_v27 = vld [vmem:[%s1343_s0 + $0x68] sm:$0xff]  ;;  %v964_v29 = vpack.c.bf16 %v252_v26, %v251_v25  ;;  %v254_v31 = vld [vmem:[%s1344_s2 + $0x58] sm:$0xff]  ;;  %v31_v33 = vld [vmem:[%s1343_s0 + $0x70] sm:$0xff] }
   0xa   :  { %67 = vperm.xlu1 %1042, %v22_v5   ;;  %64 = vperm.xlu0 %1041, %v21_v6   ;;  %v32_v32 = vld [vmem:[%s1343_s0 + $0x78] sm:$0xff]  ;;  %v968_v34 = vpack.c.bf16 %v254_v31, %v253_v30  ;;  %v255_v35 = vld [vmem:[%s1344_s2 + $0x60] sm:$0xff]  ;;  %v256_v36 = vld [vmem:[%s1344_s2 + $0x68] sm:$0xff] }
   0xb   :  { %v34_v37 = vld [vmem:[%s1345_s1 + $0x8] sm:$0xff]  ;;  %v33_v38 = vld [vmem:[%s1345_s1] sm:$0xff]  ;;  %v972_v39 = vpack.c.bf16 %v256_v36, %v255_v35  ;;  %v257_v40 = vld [vmem:[%s1344_s2 + $0x70] sm:$0xff] }
   0xc   :  { %955 = vmatpush3.bf16.msra.mxu1 %v952_v14  ;;  %v258_v41 = vld [vmem:[%s1344_s2 + $0x78] sm:$0xff]  ;;  %v35_v43 = vld [vmem:[%s1345_s1 + $0x10] sm:$0xff]  ;;  %v404_v45 = vld [vmem:[%s1346_s3] sm:$0xff] }
   0xd   :  { %957 = vmatprep.subr.bf16.mxu1 %v956_v19  ;;  %v36_v42 = vld [vmem:[%s1345_s1 + $0x18] sm:$0xff]  ;;  %v976_v44 = vpack.c.bf16 %v258_v41, %v257_v40  ;;  %v405_v46 = vld [vmem:[%s1346_s3 + $0x8] sm:$0xff]  ;;  %v37_v48 = vld [vmem:[%s1345_s1 + $0x20] sm:$0xff] }
   0xe   :  { %73 = vperm.xlu1 %1042, %v24_v7   ;;  %70 = vperm.xlu0 %1041, %v23_v8   ;;  %v38_v47 = vld [vmem:[%s1345_s1 + $0x28] sm:$0xff]  ;;  %v980_v49 = vpack.c.bf16 %v405_v46, %v404_v45  ;;  %v40_v50 = vld [vmem:[%s1345_s1 + $0x38] sm:$0xff]  ;;  %v39_v51 = vld [vmem:[%s1345_s1 + $0x30] sm:$0xff] }
   0xf   :  { %v42_v52 = vld [vmem:[%s1345_s1 + $0x48] sm:$0xff]  ;;  %v41_v53 = vld [vmem:[%s1345_s1 + $0x40] sm:$0xff]  ;;  %v44_v54 = vld [vmem:[%s1345_s1 + $0x58] sm:$0xff] }
  0x10   :  { %959 = vmatpush3.bf16.msra.mxu1 %v956_v19  ;;  %v43_v55 = vld [vmem:[%s1345_s1 + $0x50] sm:$0xff]  ;;  %v46_v56 = vld [vmem:[%s1345_s1 + $0x68] sm:$0xff]  ;;  %v45_v57 = vld [vmem:[%s1345_s1 + $0x60] sm:$0xff] }
  0x11   :  { %961 = vmatprep.subr.bf16.mxu1 %v960_v24  ;;  %v48_v58 = vld [vmem:[%s1345_s1 + $0x78] sm:$0xff]  ;;  %v47_v59 = vld [vmem:[%s1345_s1 + $0x70] sm:$0xff]  ;;  %v408_v6 = vld [vmem:[%s1346_s3 + $0x20] sm:$0xff] }
  0x12   :  { %79 = vperm.xlu1 %1042, %v26_v17   ;;  %76 = vperm.xlu0 %1041, %v25_v18   ;;  %v406_v0 = vld [vmem:[%s1346_s3 + $0x10] sm:$0xff]  ;;  %v407_v1 = vld [vmem:[%s1346_s3 + $0x18] sm:$0xff]  ;;  %v409_v7 = vld [vmem:[%s1346_s3 + $0x28] sm:$0xff] }
  0x13   :  { %v984_v5 = vpack.c.bf16 %v407_v1, %v406_v0  ;;  %v988_v10 = vpack.c.bf16 %v409_v7, %v408_v6  ;;  %v410_v11 = vld [vmem:[%s1346_s3 + $0x30] sm:$0xff]  ;;  %v411_v12 = vld [vmem:[%s1346_s3 + $0x38] sm:$0xff]  ;;  %v412_v16 = vld [vmem:[%s1346_s3 + $0x40] sm:$0xff] }
  0x14   :  { %963 = vmatpush3.bf16.msra.mxu1 %v960_v24  ;;  %v992_v15 = vpack.c.bf16 %v411_v12, %v410_v11  ;;  %v413_v17 = vld [vmem:[%s1346_s3 + $0x48] sm:$0xff]  ;;  %v414_v21 = vld [vmem:[%s1346_s3 + $0x50] sm:$0xff]  ;;  %v416_v26 = vld [vmem:[%s1346_s3 + $0x60] sm:$0xff] }
  0x15   :  { %965 = vmatprep.subr.bf16.mxu1 %v964_v29  ;;  %v996_v20 = vpack.c.bf16 %v413_v17, %v412_v16  ;;  %v418_v31 = vld [vmem:[%s1346_s3 + $0x70] sm:$0xff] }
  0x16   :  { %85 = vperm.xlu1 %1042, %v28_v22   ;;  %82 = vperm.xlu0 %1041, %v27_v23   ;;  %v415_v22 = vld [vmem:[%s1346_s3 + $0x58] sm:$0xff] }
  0x17   :  { %v1000_v25 = vpack.c.bf16 %v415_v22, %v414_v21 }
  0x18   :  { %967 = vmatpush3.bf16.msra.mxu1 %v964_v29 }
  0x19   :  { %969 = vmatprep.subr.bf16.mxu1 %v968_v34 }
  0x1a   :  { %91 = vperm.xlu1 %1042, %v30_v27   ;;  %88 = vperm.xlu0 %1041, %v29_v28   ;;  %v417_v27 = vld [vmem:[%s1346_s3 + $0x68] sm:$0xff] }
  0x1b   :  { %v1004_v30 = vpack.c.bf16 %v417_v27, %v416_v26 }
  0x1c   :  { %971 = vmatpush3.bf16.msra.mxu1 %v968_v34 }
  0x1d   :  { %973 = vmatprep.subr.bf16.mxu1 %v972_v39 }
  0x1e   :  { %97 = vperm.xlu1 %1042, %v32_v32   ;;  %94 = vperm.xlu0 %1041, %v31_v33   ;;  %v419_v32 = vld [vmem:[%s1346_s3 + $0x78] sm:$0xff] }
  0x1f   :  { %v1008_v35 = vpack.c.bf16 %v419_v32, %v418_v31 }
  0x20   :  { %975 = vmatpush3.bf16.msra.mxu1 %v972_v39 }
  0x21   :  { %977 = vmatprep.subr.bf16.mxu1 %v976_v44 }
  0x22   :  { %151 = vperm.xlu1 %1042, %v34_v37   ;;  %148 = vperm.xlu0 %1041, %v33_v38  }
  0x24   :  { %979 = vmatpush3.bf16.msra.mxu1 %v976_v44 }
  0x25   :  { %981 = vmatprep.subr.bf16.mxu1 %v980_v49 }
  0x26   :  { %157 = vperm.xlu1 %1042, %v36_v42   ;;  %154 = vperm.xlu0 %1041, %v35_v43  }
  0x2a   :  { %163 = vperm.xlu1 %1042, %v38_v47   ;;  %160 = vperm.xlu0 %1041, %v37_v48  }
  0x2e   :  { %169 = vperm.xlu1 %1042, %v40_v50   ;;  %166 = vperm.xlu0 %1041, %v39_v51  }
  0x32   :  { %175 = vperm.xlu1 %1042, %v42_v52   ;;  %172 = vperm.xlu0 %1041, %v41_v53   ;;  %v1045_v52 = vmov 0.0|0.0   ;;  %v1047_v53 = vmov 0.0  }
  0x33   :  { %1012 = vmatprep.subr.bf16.mxu0 %v1045_v52 }
  0x36   :  { %181 = vperm.xlu1 %1042, %v44_v54   ;;  %178 = vperm.xlu0 %1041, %v43_v55  }
  0x3a   :  { %187 = vperm.xlu1 %1042, %v46_v56   ;;  %184 = vperm.xlu0 %1041, %v45_v57  }
  0x3e   :  { %193 = vperm.xlu1 %1042, %v48_v58   ;;  %190 = vperm.xlu0 %1041, %v47_v59  }
  0x81   :  { %v59_v62 = vpop.permute.xlu1 %58  ;;  %v53_v63 = vpop.permute.xlu0 %52 }
  0x82   :  { %vm99_vm0 = vcmp.eq.s32.totalorder %v1223_v61, %v53_v63  ;;  %vm101_vm1 = vcmp.eq.s32.totalorder %v1223_v61, %v59_v62 }
  0x83   :  { %833 = vmatprep.mubr.msk.f32.mxu1 %vm99_vm0, %v1044_v2 }
  0x85   :  { %v62_v3 = vpop.permute.xlu1 %61  ;;  %v56_v4 = vpop.permute.xlu0 %55 }
  0x86   :  { %vm100_vm2 = vcmp.eq.s32.totalorder %v1223_v61, %v56_v4  ;;  %vm102_vm3 = vcmp.eq.s32.totalorder %v1223_v61, %v62_v3 }
  0x87   :  { %834 = vmatmul.mubr.msk.f32.vlgmr.msra.gmra.mrb[0].mxu1 %vm100_vm2, %v1044_v2 }
  0x88   :  { %983 = vmatpush3.bf16.msra.mxu1 %v980_v49  ;;  %836 = vmatprep.mubr.msk.f32.mxu1 %vm101_vm1, %v1044_v2 }
  0x89   :  { %v68_v8 = vpop.permute.xlu1 %67  ;;  %v65_v9 = vpop.permute.xlu0 %64  ;;  %985 = vmatprep.subr.bf16.mxu1 %v984_v5 }
  0x8a   :  { %vm103_vm4 = vcmp.eq.s32.totalorder %v1223_v61, %v65_v9  ;;  %vm104_vm5 = vcmp.eq.s32.totalorder %v1223_v61, %v68_v8 }
  0x8b   :  { %837 = vmatmul.mubr.msk.f32.gmra.mrb[2].mxu1 %vm102_vm3, %v1044_v2 }
  0x8c   :  { %987 = vmatpush3.bf16.msra.mxu1 %v984_v5  ;;  %839 = vmatprep.mubr.msk.f32.mxu1 %vm103_vm4, %v1044_v2 }
  0x8d   :  { %v74_v13 = vpop.permute.xlu1 %73  ;;  %v71_v14 = vpop.permute.xlu0 %70  ;;  %989 = vmatprep.subr.bf16.mxu1 %v988_v10 }
  0x8e   :  { %vm105_vm6 = vcmp.eq.s32.totalorder %v1223_v61, %v71_v14  ;;  %vm106_vm7 = vcmp.eq.s32.totalorder %v1223_v61, %v74_v13 }
  0x8f   :  { %840 = vmatmul.mubr.msk.f32.gmra.mrb[4].mxu1 %vm104_vm5, %v1044_v2 }
  0x90   :  { %991 = vmatpush3.bf16.msra.mxu1 %v988_v10  ;;  %842 = vmatprep.mubr.msk.f32.mxu1 %vm105_vm6, %v1044_v2 }
  0x91   :  { %v80_v18 = vpop.permute.xlu1 %79  ;;  %v77_v19 = vpop.permute.xlu0 %76  ;;  %993 = vmatprep.subr.bf16.mxu1 %v992_v15 }
  0x92   :  { %vm107_vm8 = vcmp.eq.s32.totalorder %v1223_v61, %v77_v19  ;;  %vm108_vm9 = vcmp.eq.s32.totalorder %v1223_v61, %v80_v18 }
  0x93   :  { %843 = vmatmul.mubr.msk.f32.gmra.mrb[6].mxu1 %vm106_vm7, %v1044_v2 }
  0x94   :  { %995 = vmatpush3.bf16.msra.mxu1 %v992_v15  ;;  %845 = vmatprep.mubr.msk.f32.mxu1 %vm107_vm8, %v1044_v2 }
  0x95   :  { %v86_v23 = vpop.permute.xlu1 %85  ;;  %v83_v24 = vpop.permute.xlu0 %82  ;;  %997 = vmatprep.subr.bf16.mxu1 %v996_v20 }
  0x96   :  { %vm109_vm10 = vcmp.eq.s32.totalorder %v1223_v61, %v83_v24  ;;  %vm110_vm11 = vcmp.eq.s32.totalorder %v1223_v61, %v86_v23 }
  0x97   :  { %846 = vmatmul.mubr.msk.f32.gmra.mrb[8].mxu1 %vm108_vm9, %v1044_v2 }
  0x98   :  { %999 = vmatpush3.bf16.msra.mxu1 %v996_v20  ;;  %848 = vmatprep.mubr.msk.f32.mxu1 %vm109_vm10, %v1044_v2 }
  0x99   :  { %v92_v28 = vpop.permute.xlu1 %91  ;;  %v89_v29 = vpop.permute.xlu0 %88  ;;  %1001 = vmatprep.subr.bf16.mxu1 %v1000_v25 }
  0x9a   :  { %vm111_vm12 = vcmp.eq.s32.totalorder %v1223_v61, %v89_v29  ;;  %vm112_vm13 = vcmp.eq.s32.totalorder %v1223_v61, %v92_v28 }
  0x9b   :  { %849 = vmatmul.mubr.msk.f32.gmra.mrb[10].mxu1 %vm110_vm11, %v1044_v2 }
  0x9c   :  { %1003 = vmatpush3.bf16.msra.mxu1 %v1000_v25  ;;  %851 = vmatprep.mubr.msk.f32.mxu1 %vm111_vm12, %v1044_v2 }
  0x9d   :  { %v98_v33 = vpop.permute.xlu1 %97  ;;  %v95_v34 = vpop.permute.xlu0 %94  ;;  %1005 = vmatprep.subr.bf16.mxu1 %v1004_v30 }
  0x9e   :  { %vm113_vm14 = vcmp.eq.s32.totalorder %v1223_v61, %v95_v34  ;;  %vm114_vm15 = vcmp.eq.s32.totalorder %v1223_v61, %v98_v33 }
  0x9f   :  { %852 = vmatmul.mubr.msk.f32.gmra.mrb[12].mxu1 %vm112_vm13, %v1044_v2 }
  0xa0   :  { %1007 = vmatpush3.bf16.msra.mxu1 %v1004_v30  ;;  %854 = vmatprep.mubr.msk.f32.mxu1 %vm113_vm14, %v1044_v2 }
  0xa1   :  { %v152_v36 = vpop.permute.xlu1 %151  ;;  %v149_v37 = vpop.permute.xlu0 %148  ;;  %1009 = vmatprep.subr.bf16.mxu1 %v1008_v35 }
  0xa2   :  { %vm195_vm0 = vcmp.eq.s32.totalorder %v1223_v61, %v149_v37  ;;  %vm196_vm1 = vcmp.eq.s32.totalorder %v1223_v61, %v152_v36 }
  0xa3   :  { %855 = vmatmul.mubr.msk.f32.gmra.mrb[14].mxu1 %vm114_vm15, %v1044_v2 }
  0xa4   :  { %1011 = vmatpush3.bf16.msra.mxu1 %v1008_v35  ;;  %889 = vmatprep.mubr.msk.f32.mxu1 %vm195_vm0, %v1044_v2  ;;  %vm1046_vm0 = vmmov 0  }
  0xa5   :  { %v158_v38 = vpop.permute.xlu1 %157  ;;  %v155_v39 = vpop.permute.xlu0 %154  ;;  %945 = vmatprep.mubr.msk.f32.mxu0 %vm1046_vm0, %v1047_v53 }
  0xa6   :  { %vm197_vm2 = vcmp.eq.s32.totalorder %v1223_v61, %v155_v39  ;;  %vm198_vm3 = vcmp.eq.s32.totalorder %v1223_v61, %v158_v38 }
  0xa7   :  { %890 = vmatmul.mubr.msk.f32.vlgmr.msra.gmra.mrb[16].mxu1 %vm196_vm1, %v1044_v2 }
  0xa8   :  { %892 = vmatprep.mubr.msk.f32.mxu1 %vm197_vm2, %v1044_v2 }
  0xa9   :  { %v164_v40 = vpop.permute.xlu1 %163  ;;  %v161_v41 = vpop.permute.xlu0 %160 }
  0xaa   :  { %vm199_vm4 = vcmp.eq.s32.totalorder %v1223_v61, %v161_v41  ;;  %vm200_vm5 = vcmp.eq.s32.totalorder %v1223_v61, %v164_v40 }
  0xab   :  { %893 = vmatmul.mubr.msk.f32.gmra.mrb[18].mxu1 %vm198_vm3, %v1044_v2 }
  0xac   :  { %895 = vmatprep.mubr.msk.f32.mxu1 %vm199_vm4, %v1044_v2 }
  0xad   :  { %v170_v42 = vpop.permute.xlu1 %169  ;;  %v167_v43 = vpop.permute.xlu0 %166 }
  0xae   :  { %vm201_vm6 = vcmp.eq.s32.totalorder %v1223_v61, %v167_v43  ;;  %vm202_vm7 = vcmp.eq.s32.totalorder %v1223_v61, %v170_v42 }
  0xaf   :  { %896 = vmatmul.mubr.msk.f32.gmra.mrb[20].mxu1 %vm200_vm5, %v1044_v2 }
  0xb0   :  { %898 = vmatprep.mubr.msk.f32.mxu1 %vm201_vm6, %v1044_v2 }
  0xb1   :  { %v176_v44 = vpop.permute.xlu1 %175  ;;  %v173_v45 = vpop.permute.xlu0 %172 }
  0xb2   :  { %vm203_vm8 = vcmp.eq.s32.totalorder %v1223_v61, %v173_v45  ;;  %vm204_vm9 = vcmp.eq.s32.totalorder %v1223_v61, %v176_v44 }
  0xb3   :  { %899 = vmatmul.mubr.msk.f32.gmra.mrb[22].mxu1 %vm202_vm7, %v1044_v2 }
  0xb4   :  { %901 = vmatprep.mubr.msk.f32.mxu1 %vm203_vm8, %v1044_v2 }
  0xb5   :  { %v182_v46 = vpop.permute.xlu1 %181  ;;  %v179_v47 = vpop.permute.xlu0 %178 }
  0xb6   :  { %vm205_vm10 = vcmp.eq.s32.totalorder %v1223_v61, %v179_v47  ;;  %vm206_vm11 = vcmp.eq.s32.totalorder %v1223_v61, %v182_v46 }
  0xb7   :  { %902 = vmatmul.mubr.msk.f32.gmra.mrb[24].mxu1 %vm204_vm9, %v1044_v2 }
  0xb8   :  { %904 = vmatprep.mubr.msk.f32.mxu1 %vm205_vm10, %v1044_v2 }
  0xb9   :  { %v188_v48 = vpop.permute.xlu1 %187  ;;  %v185_v49 = vpop.permute.xlu0 %184 }
  0xba   :  { %vm207_vm12 = vcmp.eq.s32.totalorder %v1223_v61, %v185_v49  ;;  %vm208_vm13 = vcmp.eq.s32.totalorder %v1223_v61, %v188_v48 }
  0xbb   :  { %905 = vmatmul.mubr.msk.f32.gmra.mrb[26].mxu1 %vm206_vm11, %v1044_v2 }
  0xbc   :  { %907 = vmatprep.mubr.msk.f32.mxu1 %vm207_vm12, %v1044_v2 }
  0xbd   :  { %v191_v50 = vpop.permute.xlu0 %190  ;;  %v194_v51 = vpop.permute.xlu1 %193 }
  0xbe   :  { %vm209_vm14 = vcmp.eq.s32.totalorder %v1223_v61, %v191_v50  ;;  %vm210_vm15 = vcmp.eq.s32.totalorder %v1223_v61, %v194_v51 }
  0xbf   :  { %908 = vmatmul.mubr.msk.f32.gmra.mrb[28].mxu1 %vm208_vm13, %v1044_v2 }
  0xc0   :  { %910 = vmatprep.mubr.msk.f32.mxu1 %vm209_vm14, %v1044_v2 }
  0xc3   :  { %911 = vmatmul.mubr.msk.f32.gmra.mrb[30].mxu1 %vm210_vm15, %v1044_v2 }
 0x15a   :  { %v835_v54 = vpop.f32.mrb[0].mxu1 }
 0x15b   :  { %v325_v55 = vpop.f32.mrb[1].mxu1 }
 0x15e   :  { %v838_v56 = vpop.f32.mrb[2].mxu1 }
 0x15f   :  { %v335_v57 = vpop.f32.mrb[3].mxu1 }
 0x162   :  { %v841_v58 = vpop.f32.mrb[4].mxu1 }
 0x163   :  { %v345_v59 = vpop.f32.mrb[5].mxu1 }
 0x166   :  { %v844_v60 = vpop.f32.mrb[6].mxu1 }
 0x167   :  { %v355_v62 = vpop.f32.mrb[7].mxu1 }
 0x16a   :  { %v847_v63 = vpop.f32.mrb[8].mxu1 }
 0x16b   :  { %v365_v0 = vpop.f32.mrb[9].mxu1 }
 0x16e   :  { %v850_v1 = vpop.f32.mrb[10].mxu1 }
 0x16f   :  { %v375_v61 = vpop.f32.mrb[11].mxu1 }
 0x172   :  { %v853_v3 = vpop.f32.mrb[12].mxu1 }
 0x173   :  { %v385_v4 = vpop.f32.mrb[13].mxu1 }
 0x176   :  { %v856_v5 = vpop.f32.mrb[14].mxu1 }
 0x177   :  { %v395_v6 = vpop.f32.mrb[15].mxu1 }
 0x17a   :  { %v891_v7 = vpop.f32.mrb[16].mxu1 }
 0x17b   :  { %v566_v8 = vmul.f32 %v891_v7, %v835_v54  ;;  %v486_v9 = vpop.f32.mrb[17].mxu1 }
 0x17c   :  { %v565_v10 = vmul.f32 %v486_v9, %v325_v55 }
 0x17e   :  { %v894_v11 = vpop.f32.mrb[18].mxu1  ;;  %v1013_v12 = vpack.c.bf16 %v566_v8, %v565_v10 }
 0x17f   :  { %v568_v13 = vmul.f32 %v894_v11, %v838_v56  ;;  %v496_v14 = vpop.f32.mrb[19].mxu1 }
 0x180   :  { %v567_v15 = vmul.f32 %v496_v14, %v335_v57  ;;  %1014 = vmatpush3.bf16.xpose.msra.mxu0 %v1013_v12 }
 0x181   :  { %1015 = vmatprep.subr.bf16.mxu0 %v1045_v52 }
 0x182   :  { %v1016_v16 = vpack.c.bf16 %v568_v13, %v567_v15  ;;  %v897_v17 = vpop.f32.mrb[20].mxu1 }
 0x183   :  { %v570_v18 = vmul.f32 %v897_v17, %v841_v58  ;;  %v506_v19 = vpop.f32.mrb[21].mxu1 }
 0x184   :  { %v569_v20 = vmul.f32 %v506_v19, %v345_v59 }
 0x186   :  { %v1019_v21 = vpack.c.bf16 %v570_v18, %v569_v20  ;;  %v900_v22 = vpop.f32.mrb[22].mxu1 }
 0x187   :  { %v572_v23 = vmul.f32 %v900_v22, %v844_v60  ;;  %v516_v24 = vpop.f32.mrb[23].mxu1 }
 0x188   :  { %v571_v25 = vmul.f32 %v516_v24, %v355_v62  ;;  %1017 = vmatpush3.bf16.xpose.msra.mxu0 %v1016_v16 }
 0x189   :  { %1018 = vmatprep.subr.bf16.mxu0 %v1045_v52 }
 0x18a   :  { %v1022_v26 = vpack.c.bf16 %v572_v23, %v571_v25  ;;  %v903_v27 = vpop.f32.mrb[24].mxu1 }
 0x18b   :  { %v574_v28 = vmul.f32 %v903_v27, %v847_v63  ;;  %v526_v29 = vpop.f32.mrb[25].mxu1 }
 0x18c   :  { %v573_v30 = vmul.f32 %v526_v29, %v365_v0 }
 0x18e   :  { %v1025_v31 = vpack.c.bf16 %v574_v28, %v573_v30  ;;  %v906_v32 = vpop.f32.mrb[26].mxu1 }
 0x18f   :  { %v576_v33 = vmul.f32 %v906_v32, %v850_v1  ;;  %v536_v34 = vpop.f32.mrb[27].mxu1 }
 0x190   :  { %v575_v35 = vmul.f32 %v536_v34, %v375_v61  ;;  %1020 = vmatpush3.bf16.xpose.msra.mxu0 %v1019_v21 }
 0x191   :  { %1021 = vmatprep.subr.bf16.mxu0 %v1045_v52 }
 0x192   :  { %v1028_v36 = vpack.c.bf16 %v576_v33, %v575_v35  ;;  %v909_v37 = vpop.f32.mrb[28].mxu1 }
 0x193   :  { %v578_v38 = vmul.f32 %v909_v37, %v853_v3  ;;  %v546_v39 = vpop.f32.mrb[29].mxu1 }
 0x194   :  { %v577_v40 = vmul.f32 %v546_v39, %v385_v4 }
 0x196   :  { %v1031_v41 = vpack.c.bf16 %v578_v38, %v577_v40  ;;  %v912_v42 = vpop.f32.mrb[30].mxu1 }
 0x197   :  { %v580_v43 = vmul.f32 %v912_v42, %v856_v5  ;;  %v556_v44 = vpop.f32.mrb[31].mxu1 }
 0x198   :  { %v579_v45 = vmul.f32 %v556_v44, %v395_v6  ;;  %1023 = vmatpush3.bf16.xpose.msra.mxu0 %v1022_v26 }
 0x199   :  { %1024 = vmatprep.subr.bf16.mxu0 %v1045_v52 }
 0x19a   :  { %v1034_v46 = vpack.c.bf16 %v580_v43, %v579_v45 }
 0x1a0   :  { %1026 = vmatpush3.bf16.xpose.msra.mxu0 %v1025_v31 }
 0x1a1   :  { %1027 = vmatprep.subr.bf16.mxu0 %v1045_v52 }
 0x1a8   :  { %1029 = vmatpush3.bf16.xpose.msra.mxu0 %v1028_v36 }
 0x1a9   :  { %1030 = vmatprep.subr.bf16.mxu0 %v1045_v52 }
 0x1b0   :  { %1032 = vmatpush3.bf16.xpose.msra.mxu0 %v1031_v41 }
 0x1b1   :  { %1033 = vmatprep.subr.bf16.mxu0 %v1045_v52 }
 0x1b8   :  { %1035 = vmatpush3.bf16.xpose.msra.mxu0 %v1034_v46 }
 0x1bf   :  { %946 = vmatmul.mubr.f32.vlgmr.msra.gmra.mrb[0].mxu0 %v1044_v2 }
 0x292   :  { %v647_v47 = vpop.f32.mrb[0].mxu0 }
 0x293   :  { %651 = vst [vmem:[%s1347_s4] sm:$0xff] %v647_v47  ;;  %v947_v48 = vpop.f32.mrb[1].mxu0 }

</bundles_post_ra>
